<compile_context>
chip_gen: v6e
topology: v6e:2x2x1
jax: 0.10.0
libtpu: 0.0.40
codegen_flags: <defaults>
</compile_context>

<pallas_src>
import jax
import jax.numpy as jnp
from jax.experimental import pallas as pl
from jax.experimental.pallas import tpu as pltpu


# --------------------------------------------------------------------------- #
# Kernel                                                                      #
# --------------------------------------------------------------------------- #
def _policy_value_kernel(
    xin_ref,                 # (TB, IN_PAD)   bf16  [observation | hidden | 0-pad]
    w_in_ref, b_in_ref,      # block-diag fused obs/hidden projections (padded)
    w_x_ref, b_x_ref,        # observation_hidden_projection (stacked, padded)
    w_c_ref, b_c_ref,        # core_model (padded)
    w_h_ref, b_h_ref,        # fused policy+value heads (padded to 128 lanes)
    out_ref,                 # (TB, HEAD_PAD) f32  [logits | value | 0-pad]
):
    f32 = jnp.float32
    bf16 = jnp.bfloat16

    # [obs_embed | hid_embed] in a single MXU pass (block-diagonal weight).
    e = (
        jnp.dot(xin_ref[...], w_in_ref[...], preferred_element_type=f32)
        + b_in_ref[...]
    )

    # observation_hidden_projection: concat-Linear (stacked weight) + ReLU.
    x = jnp.maximum(
        jnp.dot(e.astype(bf16), w_x_ref[...], preferred_element_type=f32)
        + b_x_ref[...],
        0.0,
    )

    # core_model: Linear + ReLU.
    h = jnp.maximum(
        jnp.dot(x.astype(bf16), w_c_ref[...], preferred_element_type=f32)
        + b_c_ref[...],
        0.0,
    )

    # Fused policy+value head; 128-wide lane-dense store (pad lanes are exact
    # zeros because padded weight/bias columns are zero).
    out_ref[...] = (
        jnp.dot(h.astype(bf16), w_h_ref[...], preferred_element_type=f32)
        + b_h_ref[...]
    ).astype(out_ref.dtype)


# --------------------------------------------------------------------------- #
# Parameter packing (done once, off the hot path)                            #
# --------------------------------------------------------------------------- #
def _round_up(x, m):
    return ((x + m - 1) // m) * m


def pack_params(p):
    """Fuse + lane-pad per-layer Linear params into the kernel operand layout."""
    obs_dim, emb = p["w_op"].shape
    hid_dim = p["w_hp"].shape[0]
    core = p["w_c"].shape[1]
    n_actions = p["w_p"].shape[1]

    in_pad = _round_up(obs_dim + hid_dim, 128)      # input feature lanes
    e_pad = _round_up(2 * emb, 128)                 # [obs_embed | hid_embed] lanes
    x_pad = _round_up(emb, 128)                     # projection output lanes
    h_pad = _round_up(core, 128)                    # core output lanes
    head_pad = _round_up(n_actions + 1, 128)        # [logits | value] lanes

    bf16 = jnp.bfloat16
    f32 = jnp.float32

    # Block-diagonal fused input projection: (IN_PAD, E_PAD).
    w_in = jnp.zeros((in_pad, e_pad), f32)
    w_in = w_in.at[:obs_dim, :emb].set(p["w_op"])
    w_in = w_in.at[obs_dim:obs_dim + hid_dim, emb:2 * emb].set(p["w_hp"])
    b_in = jnp.zeros((1, e_pad), f32)
    b_in = b_in.at[:, :emb].set(p["b_op"])
    b_in = b_in.at[:, emb:2 * emb].set(p["b_hp"])

    # concat-Linear as one stacked weight: (E_PAD, X_PAD).
    w_x = jnp.zeros((e_pad, x_pad), f32)
    w_x = w_x.at[:emb, :emb].set(p["w_xo"])
    w_x = w_x.at[emb:2 * emb, :emb].set(p["w_xh"])
    b_x = jnp.zeros((1, x_pad), f32).at[:, :emb].set(p["b_x"])

    # core_model: (X_PAD, H_PAD).
    w_c = jnp.zeros((x_pad, h_pad), f32).at[:emb, :core].set(p["w_c"])
    b_c = jnp.zeros((1, h_pad), f32).at[:, :core].set(p["b_c"])

    # Fused + zero-padded policy/value heads: (H_PAD, HEAD_PAD).
    w_heads = jnp.zeros((h_pad, head_pad), f32)
    w_heads = w_heads.at[:core, :n_actions].set(p["w_p"])
    w_heads = w_heads.at[:core, n_actions:n_actions + 1].set(p["w_v"])
    b_heads = jnp.zeros((1, head_pad), f32)
    b_heads = b_heads.at[:, :n_actions].set(p["b_p"])
    b_heads = b_heads.at[:, n_actions:n_actions + 1].set(p["b_v"])

    return {
        # Weights in bf16 (MXU native); biases stay f32 (added to f32 accumulators).
        "w_in": w_in.astype(bf16), "b_in": b_in,
        "w_x": w_x.astype(bf16), "b_x": b_x,
        "w_c": w_c.astype(bf16), "b_c": b_c,
        "w_heads": w_heads.astype(bf16), "b_heads": b_heads,
        "obs_dim": int(obs_dim), "hid_dim": int(hid_dim),
        "in_pad": int(in_pad), "n_actions": int(n_actions),
        "head_pad": int(head_pad),
    }


# --------------------------------------------------------------------------- #
# Wrapper                                                                     #
# --------------------------------------------------------------------------- #
_MAX_TB = 4096  # cap per review: keeps double-buffered tiles inside v7x 64 MiB VMEM


def _choose_tiling(batch):
    """Pick (TB, num_tiles): TB <= 4096, >=2 grid steps when B >= 16 (megacore)."""
    num_tiles = max(1, -(-batch // _MAX_TB))
    if batch >= 16:
        num_tiles = max(num_tiles, 2)
    tb = _round_up(-(-batch // num_tiles), 8)
    return int(tb), int(num_tiles)


def policy_value_common_net(observation, forward_dynamics_hidden, packed):
    """Fused forward pass. Returns (policy_logits, value)."""
    obs_dim = packed["obs_dim"]
    hid_dim = packed["hid_dim"]
    in_pad = packed["in_pad"]
    n_actions = packed["n_actions"]
    head_pad = packed["head_pad"]

    B = observation.shape[0]
    TB, num_tiles = _choose_tiling(B)
    B_pad = TB * num_tiles

    # Build the padded bf16 input slab [observation | hidden | 0] once (glue).
    x_in = jnp.zeros((B_pad, in_pad), jnp.bfloat16)
    x_in = x_in.at[:B, :obs_dim].set(observation.astype(jnp.bfloat16))
    x_in = x_in.at[:B, obs_dim:obs_dim + hid_dim].set(
        forward_dynamics_hidden.astype(jnp.bfloat16)
    )

    weights = (
        packed["w_in"], packed["b_in"],
        packed["w_x"], packed["b_x"],
        packed["w_c"], packed["b_c"],
        packed["w_heads"], packed["b_heads"],
    )

    def const_spec(a):
        # Full array, constant block index -> stays VMEM-resident across steps.
        return pl.BlockSpec(a.shape, lambda i: (0, 0))

    in_specs = (
        [pl.BlockSpec((TB, in_pad), lambda i: (i, 0))]
        + [const_spec(a) for a in weights]
    )
    out_specs = pl.BlockSpec((TB, head_pad), lambda i: (i, 0))

    # Explicit VMEM budget: double-buffered in/out tiles + resident weights +
    # f32/bf16 intermediates, 2x headroom, capped at v7x's 64 MiB physical VMEM.
    weight_bytes = sum(int(a.size) * a.dtype.itemsize for a in weights)
    est = (
        2 * TB * in_pad * 2          # input tile, bf16, double-buffered
        + 2 * TB * head_pad * 4      # output tile, f32, double-buffered
        + 2 * weight_bytes           # resident weights (default double buffer)
        + 6 * TB * 128 * 4           # e/x/h f32 + bf16 temps (generous)
    )
    vmem_limit = int(min(64 * 1024 * 1024, max(32 * 1024 * 1024, 2 * est)))

    out = pl.pallas_call(
        _policy_value_kernel,
        out_shape=jax.ShapeDtypeStruct((B_pad, head_pad), jnp.float32),
        grid=(num_tiles,),
        in_specs=in_specs,
        out_specs=out_specs,
        compiler_params=pltpu.CompilerParams(
            dimension_semantics=("parallel",),
            vmem_limit_bytes=vmem_limit,
        ),
    )(x_in, *weights)

    # Slice the lane-dense slab; pad lanes/rows never leak to callers.
    logits = out[:B, :n_actions]
    value = out[:B, n_actions]
    return logits, value


# --------------------------------------------------------------------------- #
# Synthetic params + pure-JAX reference                                       #
# --------------------------------------------------------------------------- #
def init_params(key, obs_dim, hid_dim, emb_dim, core_dim, n_actions):
    """Deterministic synthetic parameter init (shapes match the Linear layers)."""
    ks = jax.random.split(key, 12)
    scale = 0.1

    def w(k, shape):
        return (scale * jax.random.normal(k, shape)).astype(jnp.float32)

    return {
        "w_op": w(ks[0], (obs_dim, emb_dim)),
        "b_op": w(ks[1], (1, emb_dim)),
        "w_hp": w(ks[2], (hid_dim, emb_dim)),
        "b_hp": w(ks[3], (1, emb_dim)),
        "w_xo": w(ks[4], (emb_dim, emb_dim)),   # first half of concat-Linear weight
        "w_xh": w(ks[5], (emb_dim, emb_dim)),   # second half of concat-Linear weight
        "b_x":  w(ks[6], (1, emb_dim)),
        "w_c":  w(ks[7], (emb_dim, core_dim)),
        "b_c":  w(ks[8], (1, core_dim)),
        "w_p":  w(ks[9], (core_dim, n_actions)),
        "b_p":  w(ks[10], (1, n_actions)),
        "w_v":  w(ks[11], (core_dim, 1)),
        "b_v":  jnp.zeros((1, 1), jnp.float32),
    }


def _reference(observation, forward_dynamics_hidden, p):
    """Pure-JAX f32 reference for correctness check (unfused layout)."""
    obs_embed = observation @ p["w_op"] + p["b_op"]
    hid_embed = forward_dynamics_hidden @ p["w_hp"] + p["b_hp"]
    x = jnp.maximum(obs_embed @ p["w_xo"] + hid_embed @ p["w_xh"] + p["b_x"], 0.0)
    h = jnp.maximum(x @ p["w_c"] + p["b_c"], 0.0)
    logits = h @ p["w_p"] + p["b_p"]
    value = (h @ p["w_v"] + p["b_v"])[:, 0]
    return logits, value


if __name__ == "__main__":
    B, OBS_DIM, HID_DIM, EMB, CORE, N_ACT = 8, 16, 16, 32, 32, 8

    key = jax.random.PRNGKey(0)
    k_obs, k_hid, k_params = jax.random.split(key, 3)

    observation = jax.random.normal(k_obs, (B, OBS_DIM), dtype=jnp.float32)
    forward_dynamics_hidden = jax.random.normal(k_hid, (B, HID_DIM), dtype=jnp.float32)
    params = init_params(k_params, OBS_DIM, HID_DIM, EMB, CORE, N_ACT)
    packed = pack_params(params)

    logits, value = policy_value_common_net(observation, forward_dynamics_hidden, packed)
    jax.block_until_ready((logits, value))

    ref_logits, ref_value = _reference(observation, forward_dynamics_hidden, params)
    # bf16 weights/activations vs f32 reference -> loosened tolerances (per review).
    assert logits.shape == ref_logits.shape and value.shape == ref_value.shape
    assert jnp.allclose(logits, ref_logits, atol=2e-2, rtol=2e-2), "logits mismatch"
    assert jnp.allclose(value, ref_value, atol=2e-2, rtol=2e-2), "value mismatch"

    # The policy "Distribution" is represented by its Categorical logits.
    # TODO(synk): torch.distributions.Distribution has no Pallas equivalent;
    # downstream sampling/log_prob should consume the returned logits.
    print("KERNEL_OK")
</pallas_src>

<mosaic_0001>
module attributes {stable_mosaic.version = 11 : i64} {
  func.func @_policy_value_kernel(%arg0: i32, %arg1: memref<8x128xbf16, #tpu.memory_space<vmem>>, %arg2: memref<128x128xbf16, #tpu.memory_space<vmem>>, %arg3: memref<1x128xf32, #tpu.memory_space<vmem>>, %arg4: memref<128x128xbf16, #tpu.memory_space<vmem>>, %arg5: memref<1x128xf32, #tpu.memory_space<vmem>>, %arg6: memref<128x128xbf16, #tpu.memory_space<vmem>>, %arg7: memref<1x128xf32, #tpu.memory_space<vmem>>, %arg8: memref<128x128xbf16, #tpu.memory_space<vmem>>, %arg9: memref<1x128xf32, #tpu.memory_space<vmem>>, %arg10: memref<8x128xf32, #tpu.memory_space<vmem>>) attributes {dimension_semantics = [#tpu.dimension_semantics<parallel>], iteration_bounds = array<i64: 1>, scalar_prefetch = 0 : i64, scratch_operands = 0 : i64, tpu.core_type = #tpu.core_type<tc>, window_params = [{transform_indices = @transform_0, window_bounds = array<i64: 8, 128>}, {pipeline_mode = #tpu.pipeline_mode<synchronous>, transform_indices = @transform_1, window_bounds = array<i64: 128, 128>}, {pipeline_mode = #tpu.pipeline_mode<synchronous>, transform_indices = @transform_2, window_bounds = array<i64: 1, 128>}, {pipeline_mode = #tpu.pipeline_mode<synchronous>, transform_indices = @transform_3, window_bounds = array<i64: 128, 128>}, {pipeline_mode = #tpu.pipeline_mode<synchronous>, transform_indices = @transform_4, window_bounds = array<i64: 1, 128>}, {pipeline_mode = #tpu.pipeline_mode<synchronous>, transform_indices = @transform_5, window_bounds = array<i64: 128, 128>}, {pipeline_mode = #tpu.pipeline_mode<synchronous>, transform_indices = @transform_6, window_bounds = array<i64: 1, 128>}, {pipeline_mode = #tpu.pipeline_mode<synchronous>, transform_indices = @transform_7, window_bounds = array<i64: 128, 128>}, {pipeline_mode = #tpu.pipeline_mode<synchronous>, transform_indices = @transform_8, window_bounds = array<i64: 1, 128>}, {transform_indices = @transform_9, window_bounds = array<i64: 8, 128>}]} {
    %c0 = arith.constant 0 : index
    %c0_0 = arith.constant 0 : index
    %0 = vector.load %arg1[%c0, %c0_0] : memref<8x128xbf16, #tpu.memory_space<vmem>>, vector<8x128xbf16>
    %c0_1 = arith.constant 0 : index
    %c0_2 = arith.constant 0 : index
    %1 = vector.load %arg2[%c0_1, %c0_2] : memref<128x128xbf16, #tpu.memory_space<vmem>>, vector<128x128xbf16>
    %cst = arith.constant dense<0.000000e+00> : vector<8x128xf32>
    %2 = tpu.matmul %0, %1, %cst {dimension_numbers = #tpu.dot_dimension_numbers<[1], [0], [0], [1], [0, 0, 1, 1], [], []>} : vector<8x128xbf16>, vector<128x128xbf16>, vector<8x128xf32> -> vector<8x128xf32>
    %c0_3 = arith.constant 0 : index
    %c0_4 = arith.constant 0 : index
    %3 = vector.load %arg3[%c0_3, %c0_4] : memref<1x128xf32, #tpu.memory_space<vmem>>, vector<1x128xf32>
    %4 = vector.broadcast %3 : vector<1x128xf32> to vector<8x128xf32>
    %5 = arith.addf %2, %4 : vector<8x128xf32>
    %6 = arith.truncf %5 : vector<8x128xf32> to vector<8x128xbf16>
    %c0_5 = arith.constant 0 : index
    %c0_6 = arith.constant 0 : index
    %7 = vector.load %arg4[%c0_5, %c0_6] : memref<128x128xbf16, #tpu.memory_space<vmem>>, vector<128x128xbf16>
    %cst_7 = arith.constant dense<0.000000e+00> : vector<8x128xf32>
    %8 = tpu.matmul %6, %7, %cst_7 {dimension_numbers = #tpu.dot_dimension_numbers<[1], [0], [0], [1], [0, 0, 1, 1], [], []>} : vector<8x128xbf16>, vector<128x128xbf16>, vector<8x128xf32> -> vector<8x128xf32>
    %c0_8 = arith.constant 0 : index
    %c0_9 = arith.constant 0 : index
    %9 = vector.load %arg5[%c0_8, %c0_9] : memref<1x128xf32, #tpu.memory_space<vmem>>, vector<1x128xf32>
    %10 = vector.broadcast %9 : vector<1x128xf32> to vector<8x128xf32>
    %11 = arith.addf %8, %10 : vector<8x128xf32>
    %cst_10 = arith.constant 0.000000e+00 : f32
    %12 = vector.broadcast %cst_10 : f32 to vector<8x128xf32>
    %13 = arith.maximumf %11, %12 : vector<8x128xf32>
    %14 = arith.truncf %13 : vector<8x128xf32> to vector<8x128xbf16>
    %c0_11 = arith.constant 0 : index
    %c0_12 = arith.constant 0 : index
    %15 = vector.load %arg6[%c0_11, %c0_12] : memref<128x128xbf16, #tpu.memory_space<vmem>>, vector<128x128xbf16>
    %cst_13 = arith.constant dense<0.000000e+00> : vector<8x128xf32>
    %16 = tpu.matmul %14, %15, %cst_13 {dimension_numbers = #tpu.dot_dimension_numbers<[1], [0], [0], [1], [0, 0, 1, 1], [], []>} : vector<8x128xbf16>, vector<128x128xbf16>, vector<8x128xf32> -> vector<8x128xf32>
    %c0_14 = arith.constant 0 : index
    %c0_15 = arith.constant 0 : index
    %17 = vector.load %arg7[%c0_14, %c0_15] : memref<1x128xf32, #tpu.memory_space<vmem>>, vector<1x128xf32>
    %18 = vector.broadcast %17 : vector<1x128xf32> to vector<8x128xf32>
    %19 = arith.addf %16, %18 : vector<8x128xf32>
    %cst_16 = arith.constant 0.000000e+00 : f32
    %20 = vector.broadcast %cst_16 : f32 to vector<8x128xf32>
    %21 = arith.maximumf %19, %20 : vector<8x128xf32>
    %22 = arith.truncf %21 : vector<8x128xf32> to vector<8x128xbf16>
    %c0_17 = arith.constant 0 : index
    %c0_18 = arith.constant 0 : index
    %23 = vector.load %arg8[%c0_17, %c0_18] : memref<128x128xbf16, #tpu.memory_space<vmem>>, vector<128x128xbf16>
    %cst_19 = arith.constant dense<0.000000e+00> : vector<8x128xf32>
    %24 = tpu.matmul %22, %23, %cst_19 {dimension_numbers = #tpu.dot_dimension_numbers<[1], [0], [0], [1], [0, 0, 1, 1], [], []>} : vector<8x128xbf16>, vector<128x128xbf16>, vector<8x128xf32> -> vector<8x128xf32>
    %c0_20 = arith.constant 0 : index
    %c0_21 = arith.constant 0 : index
    %25 = vector.load %arg9[%c0_20, %c0_21] : memref<1x128xf32, #tpu.memory_space<vmem>>, vector<1x128xf32>
    %26 = vector.broadcast %25 : vector<1x128xf32> to vector<8x128xf32>
    %27 = arith.addf %24, %26 : vector<8x128xf32>
    %c0_22 = arith.constant 0 : index
    %c0_23 = arith.constant 0 : index
    %28 = vector.load %arg10[%c0_22, %c0_23] : memref<8x128xf32, #tpu.memory_space<vmem>>, vector<8x128xf32>
    tpu.vector_store %arg10[%c0_22, %c0_23], %27 {strides = array<i32>} : memref<8x128xf32, #tpu.memory_space<vmem>>, vector<8x128xf32>,
    return
  }
  func.func @transform_0(%arg0: i32) -> (i32, i32) {
    %c0_i32 = arith.constant 0 : i32
    %c0_i32_0 = arith.constant 0 : i32
    return %arg0, %c0_i32 : i32, i32
  }
  func.func @transform_1(%arg0: i32) -> (i32, i32) {
    %c0_i32 = arith.constant 0 : i32
    %c0_i32_0 = arith.constant 0 : i32
    %c0_i32_1 = arith.constant 0 : i32
    return %c0_i32, %c0_i32_0 : i32, i32
  }
  func.func @transform_2(%arg0: i32) -> (i32, i32) {
    %c0_i32 = arith.constant 0 : i32
    %c0_i32_0 = arith.constant 0 : i32
    %c0_i32_1 = arith.constant 0 : i32
    return %c0_i32, %c0_i32_0 : i32, i32
  }
  func.func @transform_3(%arg0: i32) -> (i32, i32) {
    %c0_i32 = arith.constant 0 : i32
    %c0_i32_0 = arith.constant 0 : i32
    %c0_i32_1 = arith.constant 0 : i32
    return %c0_i32, %c0_i32_0 : i32, i32
  }
  func.func @transform_4(%arg0: i32) -> (i32, i32) {
    %c0_i32 = arith.constant 0 : i32
    %c0_i32_0 = arith.constant 0 : i32
    %c0_i32_1 = arith.constant 0 : i32
    return %c0_i32, %c0_i32_0 : i32, i32
  }
  func.func @transform_5(%arg0: i32) -> (i32, i32) {
    %c0_i32 = arith.constant 0 : i32
    %c0_i32_0 = arith.constant 0 : i32
    %c0_i32_1 = arith.constant 0 : i32
    return %c0_i32, %c0_i32_0 : i32, i32
  }
  func.func @transform_6(%arg0: i32) -> (i32, i32) {
    %c0_i32 = arith.constant 0 : i32
    %c0_i32_0 = arith.constant 0 : i32
    %c0_i32_1 = arith.constant 0 : i32
    return %c0_i32, %c0_i32_0 : i32, i32
  }
  func.func @transform_7(%arg0: i32) -> (i32, i32) {
    %c0_i32 = arith.constant 0 : i32
    %c0_i32_0 = arith.constant 0 : i32
    %c0_i32_1 = arith.constant 0 : i32
    return %c0_i32, %c0_i32_0 : i32, i32
  }
  func.func @transform_8(%arg0: i32) -> (i32, i32) {
    %c0_i32 = arith.constant 0 : i32
    %c0_i32_0 = arith.constant 0 : i32
    %c0_i32_1 = arith.constant 0 : i32
    return %c0_i32, %c0_i32_0 : i32, i32
  }
  func.func @transform_9(%arg0: i32) -> (i32, i32) {
    %c0_i32 = arith.constant 0 : i32
    %c0_i32_0 = arith.constant 0 : i32
    return %arg0, %c0_i32 : i32, i32
  }
}

</mosaic_0001>

<bundles_post_ra>
// kernel: tpu_custom_call.1
= control target key start
LH: loop header
LB: loop body
LE: loop exit
PB: predicated region body
PF: predicated region fallthrough
CT: control target
= control target key end

     0   :  { %14 = vsyncpa [#allocation3], 0  ;;  %s1032_s0 = inlined_call_operand.hbm [shape: bf16[8,128], index: 0, kind: input, shape index: {}]   ;;  %s1033_s1 = inlined_call_operand.hbm [shape: bf16[128,128], index: 1, kind: input, shape index: {}]   ;;  %s1034_s2 = inlined_call_operand.vmem [shape: f32[1,128], index: 2, kind: input, shape index: {}]   ;;  %s1035_s3 = inlined_call_operand.hbm [shape: bf16[128,128], index: 3, kind: input, shape index: {}]   ;;  %s1036_s4 = inlined_call_operand.vmem [shape: f32[1,128], index: 4, kind: input, shape index: {}]   ;;  %s1037_s5 = inlined_call_operand.hbm [shape: bf16[128,128], index: 5, kind: input, shape index: {}]   ;;  %s1038_s6 = inlined_call_operand.vmem [shape: f32[1,128], index: 6, kind: input, shape index: {}]   ;;  %s1039_s7 = inlined_call_operand.hbm [shape: bf16[128,128], index: 7, kind: input, shape index: {}]   ;;  %s1040_s8 = inlined_call_operand.vmem [shape: f32[1,128], index: 8, kind: input, shape index: {}]   ;;  %s1041_s9 = inlined_call_operand.hbm [shape: f32[8,128], index: 9, kind: output, shape index: {}]  }
   0x1   :  { %15 = vsyncpa [#allocation6], 0 }
   0x2   :  { %16 = vsyncpa [#allocation9], 0 }
   0x3   :  { %17 = vsyncpa [#allocation4], 0  ;;  %s890_s30 = smov [#allocation5]  }
   0x4   :  { %s33_s10 = sshll.u32 %s890_s30, 4  ;;  %s34_s10 = int_to_ptr.vmem [resolvable:$true] %s33_s10 }
   0x5   :  { %s770_s11 = scalar_lea.vmem %s34_s10, 1024  ;;  %p775_p1 = scmp.lt.s32.totalorder %s34_s10, %s34_s10 }
   0x6   :  { %p771_p0 = scmp.ne.s32.totalorder %s34_s10, %s770_s11  ;;  %p776_p2 = scmp.lt.s32.totalorder %s770_s11, %s770_s11 }
   0x8   :  { %p777_p3 = por %p776_p2, %p775_p1 }
   0xa   :  { %p778_p4 = pnand %p777_p3, %p771_p0 }
   0xc   :  { %781 = shalt.err (!%p778_p4)
}
   0xd   :  { %s891_s12 = smov 64   ;;  %s892_s13 = smov 4  }
   0xe   :  { %39 = dma.hbm_to_vmem [thread:$0]  %s1033_s1, 1024, %s34_s10, [#allocation6], %s891_s12, %s891_s12, %s892_s13  }
   0xf   :  { %s893_s16 = smov [#allocation8]   ;;  %s894_s18 = smov [#allocation2]  }
  0x10   :  { %s61_s17 = sshll.u32 %s893_s16, 4  ;;  %s24_s19 = sshll.u32 %s894_s18, 4  ;;  %s62_s17 = int_to_ptr.vmem [resolvable:$true] %s61_s17  ;;  %s25_s19 = int_to_ptr.vmem [resolvable:$true] %s24_s19 }
  0x11   :  { %s790_s20 = scalar_lea.vmem %s62_s17, 1024  ;;  %p795_p6 = scmp.lt.s32.totalorder %s62_s17, %s62_s17 }
  0x12   :  { %p791_p5 = scmp.ne.s32.totalorder %s62_s17, %s790_s20  ;;  %p796_p7 = scmp.lt.s32.totalorder %s790_s20, %s790_s20 }
  0x14   :  { %p797_p8 = por %p796_p7, %p795_p6 }
  0x16   :  { %p798_p9 = pnand %p797_p8, %p791_p5 }
  0x18   :  { %801 = shalt.err (!%p798_p9)
}
  0x19   :  { %67 = dma.hbm_to_vmem [thread:$0]  %s1037_s5, 1024, %s62_s17, [#allocation9], %s891_s12, %s891_s12, %s892_s13  }
  0x1a   :  { %s810_s1 = scalar_lea.vmem %s25_s19, 64  ;;  %p815_p11 = scmp.lt.s32.totalorder %s25_s19, %s25_s19 }
  0x1b   :  { %p811_p10 = scmp.ne.s32.totalorder %s25_s19, %s810_s1  ;;  %p816_p12 = scmp.lt.s32.totalorder %s810_s1, %s810_s1 }
  0x1d   :  { %p817_p13 = por %p816_p12, %p815_p11 }
  0x1f   :  { %p818_p0 = pnand %p817_p13, %p811_p10 }
  0x21   :  { %821 = shalt.err (!%p818_p0)
}
  0x22   :  { %27 = dma.hbm_to_vmem [thread:$0]  %s1032_s0, 64, %s25_s19, [#allocation3]  }
  0x23   :  { %s895_s25 = smov [#allocation7]   ;;  %s896_s27 = smov [#allocation10]  }
  0x24   :  { %s47_s26 = sshll.u32 %s895_s25, 4  ;;  %s75_s28 = sshll.u32 %s896_s27, 4  ;;  %s48_s26 = int_to_ptr.vmem [resolvable:$true] %s47_s26  ;;  %s76_s28 = int_to_ptr.vmem [resolvable:$true] %s75_s28 }
  0x25   :  { %s830_s29 = scalar_lea.vmem %s48_s26, 1024  ;;  %p835_p2 = scmp.lt.s32.totalorder %s48_s26, %s48_s26 }
  0x26   :  { %p831_p1 = scmp.ne.s32.totalorder %s48_s26, %s830_s29  ;;  %p836_p3 = scmp.lt.s32.totalorder %s830_s29, %s830_s29 }
  0x28   :  { %p837_p4 = por %p836_p3, %p835_p2 }
  0x2a   :  { %p838_p5 = pnand %p837_p4, %p831_p1 }
  0x2c   :  { %841 = shalt.err (!%p838_p5)
}
  0x2d   :  { %53 = dma.hbm_to_vmem [thread:$0]  %s1035_s3, 1024, %s48_s26, [#allocation6], %s891_s12, %s891_s12, %s892_s13  }
  0x2e   :  { %s850_s0 = scalar_lea.vmem %s76_s28, 1024  ;;  %p855_p7 = scmp.lt.s32.totalorder %s76_s28, %s76_s28 }
  0x2f   :  { %p851_p6 = scmp.ne.s32.totalorder %s76_s28, %s850_s0  ;;  %p856_p8 = scmp.lt.s32.totalorder %s850_s0, %s850_s0 }
  0x31   :  { %p857_p9 = por %p856_p8, %p855_p7 }
  0x33   :  { %p858_p10 = pnand %p857_p9, %p851_p6 }
  0x35   :  { %861 = shalt.err (!%p858_p10)
}
  0x36   :  { %81 = dma.hbm_to_vmem [thread:$0]  %s1039_s7, 1024, %s76_s28, [#allocation9], %s891_s12, %s891_s12, %s892_s13  }
  0x37   :  { %882 = dma.done.wait [#allocation3], 64  }
  0x38   :  { %883 = vsyncadd [#allocation3], 4294967232 }
  0x39   :  { %884 = dma.done.wait [#allocation6], 2048  }
  0x3a   :  { %885 = vsyncadd [#allocation6], 4294965248 }
  0x3b   :  { %886 = dma.done.wait [#allocation9], 2048  }
  0x3c   :  { %887 = vsyncadd [#allocation9], 4294965248  ;;  %v897_v0 = vmov 0.0   ;;  %vm898_vm0 = vmmov 0   ;;  %v730_v1 = vld [vmem:[#allocation5 + $0x38] sm:$0xff]   ;;  %v731_v2 = vld [vmem:[#allocation5 + $0x30] sm:$0xff]  }
  0x3d   :  { %640 = vmatprep.subr.bf16.mxu0 %v897_v0  ;;  %656 = vmatprep.mubr.msk.bf16.mxu0 %vm898_vm0, %v897_v0  ;;  %v732_v3 = vld [vmem:[#allocation5 + $0x28] sm:$0xff]   ;;  %v738_v4 = vld [vmem:[#allocation7 + $0x38] sm:$0xff]   ;;  %v733_v5 = vld [vmem:[#allocation5 + $0x20] sm:$0xff]   ;;  %s899_s16 = smov [#allocation11]  }
  0x3e   :  { %660 = vmatprep.subr.bf16.mxu1 %v897_v0  ;;  %676 = vmatprep.mubr.msk.bf16.mxu1 %vm898_vm0, %v897_v0  ;;  %v739_v6 = vld [vmem:[#allocation7 + $0x30] sm:$0xff]   ;;  %v734_v7 = vld [vmem:[#allocation5 + $0x18] sm:$0xff]   ;;  %v740_v8 = vld [vmem:[#allocation7 + $0x28] sm:$0xff]   ;;  %s557_s17 = sshll.u32 %s899_s16, 4  ;;  %s558_s17 = int_to_ptr.vmem [resolvable:$true] %s557_s17 }
  0x3f   :  { %641 = vmatpush3.bf16.msra.mxu0 %v730_v1  ;;  %661 = vmatpush3.bf16.msra.mxu1 %v738_v4  ;;  %v735_v9 = vld [vmem:[#allocation5 + $0x10] sm:$0xff]   ;;  %v741_v10 = vld [vmem:[#allocation7 + $0x20] sm:$0xff]   ;;  %v736_v11 = vld [vmem:[#allocation5 + $0x8] sm:$0xff]   ;;  %p867_p12 = scmp.lt.s32.totalorder %s558_s17, %s558_s17 }
  0x40   :  { %642 = vmatprep.subr.bf16.mxu0 %v897_v0  ;;  %662 = vmatprep.subr.bf16.mxu1 %v897_v0  ;;  %v742_v12 = vld [vmem:[#allocation7 + $0x18] sm:$0xff]   ;;  %v737_v13 = vld [vmem:[#allocation5] sm:$0xff]   ;;  %v743_v14 = vld [vmem:[#allocation7 + $0x10] sm:$0xff]  }
  0x41   :  { %v100_v15 = vld [vmem:[#allocation2] sm:$0xf]  ;;  %v744_v16 = vld [vmem:[#allocation7 + $0x8] sm:$0xff]   ;;  %v745_v17 = vld [vmem:[#allocation7] sm:$0xff]  }
  0x42   :  { %v746_v18 = vld [vmem:[#allocation8 + $0x38] sm:$0xff]   ;;  %v747_v19 = vld [vmem:[#allocation8 + $0x30] sm:$0xff]   ;;  %v748_v20 = vld [vmem:[#allocation8 + $0x28] sm:$0xff]  }
  0x43   :  { %643 = vmatpush3.bf16.msra.mxu0 %v731_v2  ;;  %663 = vmatpush3.bf16.msra.mxu1 %v739_v6  ;;  %v749_v21 = vld [vmem:[#allocation8 + $0x20] sm:$0xff]   ;;  %v750_v22 = vld [vmem:[#allocation8 + $0x18] sm:$0xff]   ;;  %v751_v23 = vld [vmem:[#allocation8 + $0x10] sm:$0xff]  }
  0x44   :  { %644 = vmatprep.subr.bf16.mxu0 %v897_v0  ;;  %664 = vmatprep.subr.bf16.mxu1 %v897_v0  ;;  %v568_v24 = vld [vmem:[%s1034_s2] ss:$0 sm:$0xff]  ;;  %v752_v31 = vld [vmem:[#allocation8 + $0x8] sm:$0xff]   ;;  %v753_v32 = vld [vmem:[#allocation8] sm:$0xff]  }
  0x45   :  { %v754_v33 = vld [vmem:[#allocation10 + $0x38] sm:$0xff]   ;;  %v755_v34 = vld [vmem:[#allocation10 + $0x30] sm:$0xff]   ;;  %v756_v35 = vld [vmem:[#allocation10 + $0x28] sm:$0xff]  }
  0x46   :  { %v757_v36 = vld [vmem:[#allocation10 + $0x20] sm:$0xff]   ;;  %v758_v37 = vld [vmem:[#allocation10 + $0x18] sm:$0xff]   ;;  %v759_v38 = vld [vmem:[#allocation10 + $0x10] sm:$0xff]  }
  0x47   :  { %645 = vmatpush3.bf16.msra.mxu0 %v732_v3  ;;  %665 = vmatpush3.bf16.msra.mxu1 %v740_v8  ;;  %v577_v39 = vld [vmem:[%s1036_s4] ss:$0 sm:$0xff]  ;;  %v760_v47 = vld [vmem:[#allocation10 + $0x8] sm:$0xff]   ;;  %v761_v48 = vld [vmem:[#allocation10] sm:$0xff]  }
  0x48   :  { %646 = vmatprep.subr.bf16.mxu0 %v897_v0  ;;  %666 = vmatprep.subr.bf16.mxu1 %v897_v0  ;;  %v586_v49 = vld [vmem:[%s1038_s6] ss:$0 sm:$0xff]  ;;  %s862_s6 = scalar_lea.vmem %s558_s17, 128 }
  0x49   :  { %v595_v57 = vld [vmem:[%s1040_s8] ss:$0 sm:$0xff]  ;;  %p863_p11 = scmp.ne.s32.totalorder %s558_s17, %s862_s6  ;;  %p868_p13 = scmp.lt.s32.totalorder %s862_s6, %s862_s6 }
  0x4b   :  { %647 = vmatpush3.bf16.msra.mxu0 %v733_v5  ;;  %667 = vmatpush3.bf16.msra.mxu1 %v741_v10  ;;  %p869_p0 = por %p868_p13, %p867_p12 }
  0x4c   :  { %648 = vmatprep.subr.bf16.mxu0 %v897_v0  ;;  %668 = vmatprep.subr.bf16.mxu1 %v897_v0 }
  0x4d   :  { %p870_p1 = pnand %p869_p0, %p863_p11 }
  0x4f   :  { %649 = vmatpush3.bf16.msra.mxu0 %v734_v7  ;;  %669 = vmatpush3.bf16.msra.mxu1 %v742_v12 }
  0x50   :  { %650 = vmatprep.subr.bf16.mxu0 %v897_v0  ;;  %670 = vmatprep.subr.bf16.mxu1 %v897_v0 }
  0x53   :  { %651 = vmatpush3.bf16.msra.mxu0 %v735_v9  ;;  %671 = vmatpush3.bf16.msra.mxu1 %v743_v14 }
  0x54   :  { %652 = vmatprep.subr.bf16.mxu0 %v897_v0  ;;  %672 = vmatprep.subr.bf16.mxu1 %v897_v0 }
  0x57   :  { %653 = vmatpush3.bf16.msra.mxu0 %v736_v11  ;;  %673 = vmatpush3.bf16.msra.mxu1 %v744_v16 }
  0x58   :  { %654 = vmatprep.subr.bf16.mxu0 %v897_v0  ;;  %674 = vmatprep.subr.bf16.mxu1 %v897_v0 }
  0x5b   :  { %655 = vmatpush3.bf16.msra.mxu0 %v737_v13  ;;  %675 = vmatpush3.bf16.msra.mxu1 %v745_v17 }
  0x5c   :  { %680 = vmatprep.subr.bf16.mxu0 %v897_v0  ;;  %700 = vmatprep.subr.bf16.mxu1 %v897_v0 }
  0x5e   :  { %657 = vmatmul.mubr.bf16.vlgmr.msra.gmra.mxu0 %v100_v15 }
  0x5f   :  { %696 = vmatprep.mubr.msk.bf16.mxu0 %vm898_vm0, %v897_v0  ;;  %681 = vmatpush3.bf16.msra.mxu0 %v746_v18 }
  0x60   :  { %682 = vmatprep.subr.bf16.mxu0 %v897_v0 }
  0x63   :  { %683 = vmatpush3.bf16.msra.mxu0 %v747_v19 }
  0x64   :  { %684 = vmatprep.subr.bf16.mxu0 %v897_v0 }
  0x67   :  { %685 = vmatpush3.bf16.msra.mxu0 %v748_v20 }
  0x68   :  { %686 = vmatprep.subr.bf16.mxu0 %v897_v0 }
  0x6b   :  { %687 = vmatpush3.bf16.msra.mxu0 %v749_v21 }
  0x6c   :  { %688 = vmatprep.subr.bf16.mxu0 %v897_v0 }
  0x6f   :  { %689 = vmatpush3.bf16.msra.mxu0 %v750_v22 }
  0x70   :  { %690 = vmatprep.subr.bf16.mxu0 %v897_v0 }
  0x73   :  { %691 = vmatpush3.bf16.msra.mxu0 %v751_v23 }
  0x74   :  { %692 = vmatprep.subr.bf16.mxu0 %v897_v0 }
  0x77   :  { %693 = vmatpush3.bf16.msra.mxu0 %v752_v31 }
  0x78   :  { %694 = vmatprep.subr.bf16.mxu0 %v897_v0 }
  0x7b   :  { %695 = vmatpush3.bf16.msra.mxu0 %v753_v32 }
 0x11e   :  { %v206_v25 = vpop.f32.mrf.mxu0 }
 0x11f   :  { %v207_v26 = vadd.f32 %v568_v24, %v206_v25 }
 0x120   :  { %v658_v27 = vpop.f32.mrf.mxu0 }
 0x121   :  { %v212_v28 = vpack.c.bf16 %v207_v26, %v207_v26 }
 0x122   :  { %v209_v29 = vpop.f32.mrf.mxu0 }
 0x123   :  { %677 = vmatmul.mubr.bf16.vlgmr.msra.gmra.mxu1 %v212_v28 }
 0x124   :  { %v659_v30 = vpop.f32.mrf.mxu0  ;;  %716 = vmatprep.mubr.msk.bf16.mxu1 %vm898_vm0, %v897_v0  ;;  %701 = vmatpush3.bf16.msra.mxu1 %v754_v33 }
 0x125   :  { %702 = vmatprep.subr.bf16.mxu1 %v897_v0 }
 0x128   :  { %703 = vmatpush3.bf16.msra.mxu1 %v755_v34 }
 0x129   :  { %704 = vmatprep.subr.bf16.mxu1 %v897_v0 }
 0x12c   :  { %705 = vmatpush3.bf16.msra.mxu1 %v756_v35 }
 0x12d   :  { %706 = vmatprep.subr.bf16.mxu1 %v897_v0 }
 0x130   :  { %707 = vmatpush3.bf16.msra.mxu1 %v757_v36 }
 0x131   :  { %708 = vmatprep.subr.bf16.mxu1 %v897_v0 }
 0x134   :  { %709 = vmatpush3.bf16.msra.mxu1 %v758_v37 }
 0x135   :  { %710 = vmatprep.subr.bf16.mxu1 %v897_v0 }
 0x138   :  { %711 = vmatpush3.bf16.msra.mxu1 %v759_v38 }
 0x139   :  { %712 = vmatprep.subr.bf16.mxu1 %v897_v0 }
 0x13c   :  { %713 = vmatpush3.bf16.msra.mxu1 %v760_v47 }
 0x13d   :  { %714 = vmatprep.subr.bf16.mxu1 %v897_v0 }
 0x140   :  { %715 = vmatpush3.bf16.msra.mxu1 %v761_v48 }
 0x1e3   :  { %v318_v40 = vpop.f32.mrf.mxu1 }
 0x1e4   :  { %v319_v41 = vadd.f32 %v577_v39, %v318_v40 }
 0x1e5   :  { %v678_v42 = vpop.f32.mrf.mxu1 }
 0x1e6   :  { %v324_v43 = vmax.f32 %v319_v41, 0.0 }
 0x1e7   :  { %v321_v44 = vpop.f32.mrf.mxu1 }
 0x1e8   :  { %v325_v45 = vpack.c.bf16 %v324_v43, %v324_v43 }
 0x1e9   :  { %v679_v46 = vpop.f32.mrf.mxu1 }
 0x1ea   :  { %697 = vmatmul.mubr.bf16.vlgmr.msra.gmra.mxu0 %v325_v45 }
 0x2aa   :  { %v431_v50 = vpop.f32.mrf.mxu0 }
 0x2ab   :  { %v432_v51 = vadd.f32 %v586_v49, %v431_v50 }
 0x2ac   :  { %v698_v52 = vpop.f32.mrf.mxu0 }
 0x2ad   :  { %v437_v53 = vmax.f32 %v432_v51, 0.0 }
 0x2ae   :  { %v434_v54 = vpop.f32.mrf.mxu0 }
 0x2af   :  { %v438_v55 = vpack.c.bf16 %v437_v53, %v437_v53 }
 0x2b0   :  { %v699_v56 = vpop.f32.mrf.mxu0 }
 0x2b1   :  { %717 = vmatmul.mubr.bf16.vlgmr.msra.gmra.mxu1 %v438_v55 }
 0x371   :  { %v544_v58 = vpop.f32.mrf.mxu1 }
 0x372   :  { %v545_v59 = vadd.f32 %v595_v57, %v544_v58 }
 0x373   :  { %v718_v60 = vpop.f32.mrf.mxu1 }
 0x374   :  { %550 = vst [vmem:[#allocation11] sm:$0xff] %v545_v59 }
 0x375   :  { %v547_v61 = vpop.f32.mrf.mxu1 }
 0x376   :  { %873 = shalt.err (!%p870_p1)
}
 0x377   :  { %560 = dma.vmem_to_hbm [thread:$0]  %s558_s17, 128, %s1041_s9, [#allocation4]   ;;  %v719_v62 = vpop.f32.mrf.mxu1 }
 0x378   :  { %888 = dma.done.wait [#allocation4], 128  }
 0x379   :  { %889 = vsyncadd [#allocation4], 4294967168 }
 0x37a   :  { %564 = vsyncpa [#allocation3], 1 }
 0x37b   :  { %565 = vsyncpa [#allocation6], 1 }
 0x37c   :  { %566 = vsyncpa [#allocation9], 1 }
 0x37d   :  { %567 = vsyncpa [#allocation4], 1 }

</bundles_post_ra>
